<compile_context>
chip_gen: v5e
topology: v5e:2x2
jax: 0.10.0
libtpu: 0.0.40
codegen_flags: <defaults>
</compile_context>

<pallas_src>
import jax
import jax.numpy as jnp
from jax.experimental import pallas as pl
from jax.experimental.pallas import tpu as pltpu


# ------------------------- config (synthetic, deterministic) -------------------------
Z_SIZE = 16
A_SIZE = 4
CNET_OUTPUT_SIZE = 12
INPUT_SIZE = Z_SIZE + A_SIZE + CNET_OUTPUT_SIZE   # 32
H_SIZE = 32
SNET_NUM_LAYERS = 2
IN_PAD = max(INPUT_SIZE, H_SIZE)                  # row count of every layer's input-weight block
GATE_COLS = 4 * H_SIZE                            # [r | z | n_i | n_h] -> 128 lanes


# ------------------------------ fused multi-layer kernel -----------------------------
def _gru_seq_kernel(x_ref, hprev_ref, wx_ref, wh_ref, b_ref,
                    hseq_ref, hnext_ref, hstate_ref):
    """One grid step = one timestep; all L GRU layers computed in-kernel.

    x_ref     : (1, 1, IN_PAD)           this step's [z; a; c] row (streamed)
    hprev_ref : (L, H)                   initial hidden state (resident; read only at t == 0)
    wx_ref    : (L, IN_PAD, 4H)  bf16    input-weight blocks  (resident)
    wh_ref    : (L, H,      4H)  bf16    hidden-weight blocks (resident)
    b_ref     : (L, 1,      4H)  f32     [b_r(fused), b_z(fused), b_ih_n, b_hh_n] (resident)
    hseq_ref  : (1, 1, H)                this step's last-layer output (streamed)
    hnext_ref : (L, H)                   final hidden state (resident; written at last step)
    hstate_ref: (L, H) f32 VMEM scratch  hidden state carried across grid steps
    """
    t = pl.program_id(0)
    num_layers, hidden = hnext_ref.shape

    @pl.when(t == 0)
    def _():
        hstate_ref[...] = hprev_ref[...]

    layer_in = x_ref[0]                                        # (1, IN_PAD) f32, stays in vregs
    for layer in range(num_layers):                            # unrolled: L is static and tiny
        if layer > 0 and hidden < IN_PAD:                      # static; no-op for this config
            layer_in = jnp.pad(layer_in, ((0, 0), (0, IN_PAD - hidden)))
        h = hstate_ref[layer:layer + 1, :]                     # (1, H) carried state, f32

        # Two small MXU matmuls -> one lane-aligned (1, 4H = 128) add.  The r/z columns of
        # wx/wh coincide, so this add already sums the r/z pre-activations (no misaligned
        # gate-slice adds).  bf16 weights, f32 accumulation.
        gates = (jnp.dot(layer_in, wx_ref[layer].astype(jnp.float32),
                         preferred_element_type=jnp.float32)
                 + jnp.dot(h, wh_ref[layer].astype(jnp.float32),
                           preferred_element_type=jnp.float32)
                 + b_ref[layer])                               # (1, 4H)

        rz = jax.nn.sigmoid(gates[:, 0:2 * hidden])            # r and z together (64 lanes)
        r = rz[:, 0:hidden]
        zg = rz[:, hidden:2 * hidden]
        n = jnp.tanh(gates[:, 2 * hidden:3 * hidden] + r * gates[:, 3 * hidden:4 * hidden])
        h_new = (1.0 - zg) * n + zg * h

        hstate_ref[layer:layer + 1, :] = h_new
        layer_in = h_new                                       # feeds the next layer

    hseq_ref[0] = layer_in                                     # last-layer output for step t

    @pl.when(t == pl.num_programs(0) - 1)
    def _():
        hnext_ref[...] = hstate_ref[...]


# ------------------------------ parameter initialization -----------------------------
def init_gru_params(key, input_size, hidden_size, num_layers):
    """PyTorch-style uniform(-1/sqrt(H), 1/sqrt(H)); weights stored transposed (in, 3H)."""
    bound = 1.0 / (hidden_size ** 0.5)
    params = []
    for layer in range(num_layers):
        in_sz = input_size if layer == 0 else hidden_size
        key, k1, k2, k3, k4 = jax.random.split(key, 5)
        wih_t = jax.random.uniform(k1, (in_sz, 3 * hidden_size), jnp.float32, -bound, bound)
        whh_t = jax.random.uniform(k2, (hidden_size, 3 * hidden_size), jnp.float32, -bound, bound)
        bih = jax.random.uniform(k3, (1, 3 * hidden_size), jnp.float32, -bound, bound)
        bhh = jax.random.uniform(k4, (1, 3 * hidden_size), jnp.float32, -bound, bound)
        params.append((wih_t, whh_t, bih, bhh))
    return params


def pack_gru_params(params, hidden_size):
    """Pack per-layer (W_ih^T, W_hh^T, b_ih, b_hh) into the 4H-column kernel layout.

    w_x[l] : (IN_PAD, 4H)  cols [ W_ih_r^T | W_ih_z^T | W_ih_n^T | 0        ]
    w_h[l] : (H,      4H)  cols [ W_hh_r^T | W_hh_z^T | 0        | W_hh_n^T ]
    b[l]   : (1,      4H)       [ b_ir+b_hr| b_iz+b_hz| b_in     | b_hn     ]
    so gates = x @ w_x + h @ w_h + b gives r/z pre-activations already summed and the two n-gate
    halves in separate lane-aligned column blocks.  Weights are stored bf16; biases stay f32.
    """
    num_layers = len(params)
    h = hidden_size
    w_x = jnp.zeros((num_layers, IN_PAD, 4 * h), jnp.float32)
    w_h = jnp.zeros((num_layers, h, 4 * h), jnp.float32)
    b = jnp.zeros((num_layers, 1, 4 * h), jnp.float32)
    for layer, (wih_t, whh_t, bih, bhh) in enumerate(params):
        in_sz = wih_t.shape[0]
        w_x = w_x.at[layer, :in_sz, 0:3 * h].set(wih_t)                     # r | z | n_i
        w_h = w_h.at[layer, :, 0:2 * h].set(whh_t[:, 0:2 * h])              # r | z
        w_h = w_h.at[layer, :, 3 * h:4 * h].set(whh_t[:, 2 * h:3 * h])      # n_h
        b = b.at[layer, :, 0:2 * h].set(bih[:, 0:2 * h] + bhh[:, 0:2 * h])  # fused r/z biases
        b = b.at[layer, :, 2 * h:3 * h].set(bih[:, 2 * h:3 * h])            # b_ih_n
        b = b.at[layer, :, 3 * h:4 * h].set(bhh[:, 2 * h:3 * h])            # b_hh_n
    return w_x.astype(jnp.bfloat16), w_h.astype(jnp.bfloat16), b


def _bf16_round(w):
    return w.astype(jnp.bfloat16).astype(jnp.float32)


def round_weights_like_kernel(params):
    """Apply the same bf16 rounding to the reference weights that the kernel storage applies."""
    return [(_bf16_round(wih_t), _bf16_round(whh_t), bih, bhh)
            for (wih_t, whh_t, bih, bhh) in params]


# ----------------------------------- forward pass ------------------------------------
def _gru_sequence(x_seq, h_prev, w_x, w_h, b):
    """Run a whole (T, INPUT_SIZE) sequence through the L-layer GRU in ONE pallas_call.

    Returns (h_seq: (T, H) last-layer output per step, h_next: (L, H) final hidden state).
    """
    seq_len = x_seq.shape[0]
    x_k = x_seq.astype(jnp.float32).reshape(seq_len, 1, INPUT_SIZE)
    if INPUT_SIZE < IN_PAD:                        # static; no pad op emitted for this config
        x_k = jnp.pad(x_k, ((0, 0), (0, 0), (0, IN_PAD - INPUT_SIZE)))

    h_seq, h_next = pl.pallas_call(
        _gru_seq_kernel,
        out_shape=(
            jax.ShapeDtypeStruct((seq_len, 1, H_SIZE), jnp.float32),       # per-step h
            jax.ShapeDtypeStruct((SNET_NUM_LAYERS, H_SIZE), jnp.float32),  # final state
        ),
        grid_spec=pltpu.PrefetchScalarGridSpec(
            num_scalar_prefetch=0,
            grid=(seq_len,),                                   # one grid step per timestep
            in_specs=[
                # streamed: this step's [z; a; c] row
                pl.BlockSpec((1, 1, IN_PAD), lambda t: (t, 0, 0)),
                # resident across all steps (constant block index -> fetched once):
                pl.BlockSpec((SNET_NUM_LAYERS, H_SIZE), lambda t: (0, 0)),
                pl.BlockSpec((SNET_NUM_LAYERS, IN_PAD, GATE_COLS), lambda t: (0, 0, 0)),
                pl.BlockSpec((SNET_NUM_LAYERS, H_SIZE, GATE_COLS), lambda t: (0, 0, 0)),
                pl.BlockSpec((SNET_NUM_LAYERS, 1, GATE_COLS), lambda t: (0, 0, 0)),
            ],
            out_specs=(
                pl.BlockSpec((1, 1, H_SIZE), lambda t: (t, 0, 0)),          # streamed per step
                pl.BlockSpec((SNET_NUM_LAYERS, H_SIZE), lambda t: (0, 0)),  # resident
            ),
            scratch_shapes=[pltpu.VMEM((SNET_NUM_LAYERS, H_SIZE), jnp.float32)],
        ),
        compiler_params=pltpu.CompilerParams(
            dimension_semantics=("arbitrary",)),   # serial GRU recurrence over time
    )(x_k, h_prev.astype(jnp.float32), w_x, w_h, b)
    return h_seq.reshape(seq_len, H_SIZE), h_next


sequence_predictor_scan = jax.jit(_gru_sequence)


@jax.jit
def sequence_predictor_forward(z, a, c, h_prev, w_x, w_h, b):
    """Exact SequencePredictor.forward semantics: one [z; a; c] timestep -> (h, h_next)."""
    x = jnp.concatenate([z, a, c], axis=0)[None, :].astype(jnp.float32)    # (1, INPUT_SIZE)
    h_seq, h_next = _gru_sequence(x, h_prev, w_x, w_h, b)
    return h_seq, h_next                                                   # h_seq == h: (1, H)


# -------------------------------- pure-JAX reference ---------------------------------
def _reference_sequence(x_seq, h_prev, params):
    """Per-step / per-layer GRU (PyTorch gate equations); f32 HIGHEST-precision matmuls."""
    hp = jax.lax.Precision.HIGHEST
    h_state = h_prev
    outs = []
    for t in range(x_seq.shape[0]):
        layer_in = x_seq[t:t + 1]
        rows = []
        for layer_idx, (wih_t, whh_t, bih, bhh) in enumerate(params):
            h = h_state[layer_idx:layer_idx + 1]
            gi = jnp.dot(layer_in, wih_t, precision=hp) + bih
            gh = jnp.dot(h, whh_t, precision=hp) + bhh
            hh = h.shape[-1]
            r = jax.nn.sigmoid(gi[:, 0:hh] + gh[:, 0:hh])
            zg = jax.nn.sigmoid(gi[:, hh:2 * hh] + gh[:, hh:2 * hh])
            n = jnp.tanh(gi[:, 2 * hh:3 * hh] + r * gh[:, 2 * hh:3 * hh])
            h_new = (1.0 - zg) * n + zg * h
            rows.append(h_new)
            layer_in = h_new
        h_state = jnp.concatenate(rows, axis=0)
        outs.append(layer_in)
    return jnp.concatenate(outs, axis=0), h_state


# -------------------------------------- main -----------------------------------------
if __name__ == "__main__":
    key = jax.random.PRNGKey(0)
    k_params, k_z, k_a, k_c, k_h, k_seq = jax.random.split(key, 6)

    params_f32 = init_gru_params(k_params, INPUT_SIZE, H_SIZE, SNET_NUM_LAYERS)
    w_x, w_h, b = pack_gru_params(params_f32, H_SIZE)
    params_ref = round_weights_like_kernel(params_f32)   # same bf16 rounding the kernel sees

    z = jax.random.normal(k_z, (Z_SIZE,), jnp.float32)
    a = jax.random.normal(k_a, (A_SIZE,), jnp.float32)
    c = jax.random.normal(k_c, (CNET_OUTPUT_SIZE,), jnp.float32)
    h_prev = jax.random.normal(k_h, (SNET_NUM_LAYERS, H_SIZE), jnp.float32)

    # --- 1) module-equivalent single-step forward (PyTorch semantics) ---
    h, h_next = sequence_predictor_forward(z, a, c, h_prev, w_x, w_h, b)
    jax.block_until_ready((h, h_next))
    x0 = jnp.concatenate([z, a, c], axis=0)[None, :]
    h_ref, h_next_ref = _reference_sequence(x0, h_prev, params_ref)
    assert h.shape == (1, H_SIZE) and h_next.shape == (SNET_NUM_LAYERS, H_SIZE)
    assert jnp.allclose(h, h_ref, atol=1e-4, rtol=1e-4)
    assert jnp.allclose(h_next, h_next_ref, atol=1e-4, rtol=1e-4)

    # --- 2) T-step sequence in ONE dispatch (the structural perf win from the review) ---
    T = 8
    x_seq = jax.random.normal(k_seq, (T, INPUT_SIZE), jnp.float32)
    h_seq, h_last = sequence_predictor_scan(x_seq, h_prev, w_x, w_h, b)
    jax.block_until_ready((h_seq, h_last))
    h_seq_ref, h_last_ref = _reference_sequence(x_seq, h_prev, params_ref)
    assert h_seq.shape == (T, H_SIZE) and h_last.shape == (SNET_NUM_LAYERS, H_SIZE)
    assert jnp.allclose(h_seq, h_seq_ref, atol=1e-4, rtol=1e-4)
    assert jnp.allclose(h_last, h_last_ref, atol=1e-4, rtol=1e-4)

    print("KERNEL_OK")
</pallas_src>

<mosaic_0001>
module attributes {stable_mosaic.version = 11 : i64} {
  func.func @_gru_seq_kernel(%arg0: i32, %arg1: memref<1x1x32xf32, #tpu.memory_space<vmem>>, %arg2: memref<2x32xf32, #tpu.memory_space<vmem>>, %arg3: memref<2x32x128xbf16, #tpu.memory_space<vmem>>, %arg4: memref<2x32x128xbf16, #tpu.memory_space<vmem>>, %arg5: memref<2x1x128xf32, #tpu.memory_space<vmem>>, %arg6: memref<1x1x32xf32, #tpu.memory_space<vmem>>, %arg7: memref<2x32xf32, #tpu.memory_space<vmem>>, %arg8: memref<2x32xf32, #tpu.memory_space<vmem>>) attributes {dimension_semantics = [#tpu.dimension_semantics<arbitrary>], iteration_bounds = array<i64: 1>, scalar_prefetch = 0 : i64, scratch_operands = 1 : i64, tpu.core_type = #tpu.core_type<tc>, window_params = [{transform_indices = @transform_0, window_bounds = array<i64: 1, 1, 32>}, {pipeline_mode = #tpu.pipeline_mode<synchronous>, transform_indices = @transform_1, window_bounds = array<i64: 2, 32>}, {pipeline_mode = #tpu.pipeline_mode<synchronous>, transform_indices = @transform_2, window_bounds = array<i64: 2, 32, 128>}, {pipeline_mode = #tpu.pipeline_mode<synchronous>, transform_indices = @transform_3, window_bounds = array<i64: 2, 32, 128>}, {pipeline_mode = #tpu.pipeline_mode<synchronous>, transform_indices = @transform_4, window_bounds = array<i64: 2, 1, 128>}, {transform_indices = @transform_5, window_bounds = array<i64: 1, 1, 32>}, {pipeline_mode = #tpu.pipeline_mode<synchronous>, transform_indices = @transform_6, window_bounds = array<i64: 2, 32>}]} {
    %c0_i32 = arith.constant 0 : i32
    %0 = arith.cmpi eq, %arg0, %c0_i32 : i32
    %1 = arith.extui %0 : i1 to i32
    %c0_i32_0 = arith.constant 0 : i32
    %2 = arith.cmpi ne, %1, %c0_i32_0 : i32
    scf.if %2 {
      %c0_40 = arith.constant 0 : index
      %c0_41 = arith.constant 0 : index
      %75 = vector.load %arg2[%c0_40, %c0_41] : memref<2x32xf32, #tpu.memory_space<vmem>>, vector<2x32xf32>
      %c0_42 = arith.constant 0 : index
      %c0_43 = arith.constant 0 : index
      %76 = vector.load %arg8[%c0_42, %c0_43] : memref<2x32xf32, #tpu.memory_space<vmem>>, vector<2x32xf32>
      tpu.vector_store %arg8[%c0_42, %c0_43], %75 {strides = array<i32>} : memref<2x32xf32, #tpu.memory_space<vmem>>, vector<2x32xf32>,
    } else {
    }
    %c0 = arith.constant 0 : index
    %c0_1 = arith.constant 0 : index
    %c0_2 = arith.constant 0 : index
    %3 = vector.load %arg1[%c0, %c0_1, %c0_2] : memref<1x1x32xf32, #tpu.memory_space<vmem>>, vector<1x1x32xf32>
    %4 = vector.shape_cast %3 : vector<1x1x32xf32> to vector<1x32xf32>
    %c0_3 = arith.constant 0 : index
    %c0_4 = arith.constant 0 : index
    %5 = vector.load %arg8[%c0_3, %c0_4] : memref<2x32xf32, #tpu.memory_space<vmem>>, vector<1x32xf32>
    %c0_5 = arith.constant 0 : index
    %c0_6 = arith.constant 0 : index
    %c0_7 = arith.constant 0 : index
    %6 = vector.load %arg3[%c0_5, %c0_6, %c0_7] : memref<2x32x128xbf16, #tpu.memory_space<vmem>>, vector<1x32x128xbf16>
    %7 = vector.shape_cast %6 : vector<1x32x128xbf16> to vector<32x128xbf16>
    %8 = arith.extf %7 : vector<32x128xbf16> to vector<32x128xf32>
    %cst = arith.constant dense<0.000000e+00> : vector<1x128xf32>
    %9 = tpu.matmul %4, %8, %cst {dimension_numbers = #tpu.dot_dimension_numbers<[1], [0], [0], [1], [0, 0, 1, 1], [], []>} : vector<1x32xf32>, vector<32x128xf32>, vector<1x128xf32> -> vector<1x128xf32>
    %c0_8 = arith.constant 0 : index
    %c0_9 = arith.constant 0 : index
    %c0_10 = arith.constant 0 : index
    %10 = vector.load %arg4[%c0_8, %c0_9, %c0_10] : memref<2x32x128xbf16, #tpu.memory_space<vmem>>, vector<1x32x128xbf16>
    %11 = vector.shape_cast %10 : vector<1x32x128xbf16> to vector<32x128xbf16>
    %12 = arith.extf %11 : vector<32x128xbf16> to vector<32x128xf32>
    %cst_11 = arith.constant dense<0.000000e+00> : vector<1x128xf32>
    %13 = tpu.matmul %5, %12, %cst_11 {dimension_numbers = #tpu.dot_dimension_numbers<[1], [0], [0], [1], [0, 0, 1, 1], [], []>} : vector<1x32xf32>, vector<32x128xf32>, vector<1x128xf32> -> vector<1x128xf32>
    %14 = arith.addf %9, %13 : vector<1x128xf32>
    %c0_12 = arith.constant 0 : index
    %c0_13 = arith.constant 0 : index
    %c0_14 = arith.constant 0 : index
    %15 = vector.load %arg5[%c0_12, %c0_13, %c0_14] : memref<2x1x128xf32, #tpu.memory_space<vmem>>, vector<1x1x128xf32>
    %16 = vector.shape_cast %15 : vector<1x1x128xf32> to vector<1x128xf32>
    %17 = arith.addf %14, %16 : vector<1x128xf32>
    %18 = vector.extract_strided_slice %17 {offsets = [0, 0], sizes = [1, 64], strides = [1, 1]} : vector<1x128xf32> to vector<1x64xf32>
    %19 = arith.negf %18 : vector<1x64xf32>
    %20 = math.exp %19 : vector<1x64xf32>
    %cst_15 = arith.constant 1.000000e+00 : f32
    %21 = vector.broadcast %cst_15 : f32 to vector<1x64xf32>
    %22 = arith.addf %21, %20 : vector<1x64xf32>
    %23 = arith.divf %21, %22 : vector<1x64xf32>
    %24 = vector.extract_strided_slice %23 {offsets = [0, 0], sizes = [1, 32], strides = [1, 1]} : vector<1x64xf32> to vector<1x32xf32>
    %25 = vector.extract_strided_slice %23 {offsets = [0, 32], sizes = [1, 32], strides = [1, 1]} : vector<1x64xf32> to vector<1x32xf32>
    %26 = vector.extract_strided_slice %17 {offsets = [0, 64], sizes = [1, 32], strides = [1, 1]} : vector<1x128xf32> to vector<1x32xf32>
    %27 = vector.extract_strided_slice %17 {offsets = [0, 96], sizes = [1, 32], strides = [1, 1]} : vector<1x128xf32> to vector<1x32xf32>
    %28 = arith.mulf %24, %27 : vector<1x32xf32>
    %29 = arith.addf %26, %28 : vector<1x32xf32>
    %30 = math.tanh %29 : vector<1x32xf32>
    %cst_16 = arith.constant 1.000000e+00 : f32
    %31 = vector.broadcast %cst_16 : f32 to vector<1x32xf32>
    %32 = arith.subf %31, %25 : vector<1x32xf32>
    %33 = arith.mulf %32, %30 : vector<1x32xf32>
    %34 = arith.mulf %25, %5 : vector<1x32xf32>
    %35 = arith.addf %33, %34 : vector<1x32xf32>
    %c0_17 = arith.constant 0 : index
    %c0_18 = arith.constant 0 : index
    %36 = vector.load %arg8[%c0_17, %c0_18] : memref<2x32xf32, #tpu.memory_space<vmem>>, vector<1x32xf32>
    tpu.vector_store %arg8[%c0_17, %c0_18], %35 {strides = array<i32>} : memref<2x32xf32, #tpu.memory_space<vmem>>, vector<1x32xf32>,
    %c1 = arith.constant 1 : index
    %c0_19 = arith.constant 0 : index
    %37 = vector.load %arg8[%c1, %c0_19] : memref<2x32xf32, #tpu.memory_space<vmem>>, vector<1x32xf32>
    %c1_20 = arith.constant 1 : index
    %c0_21 = arith.constant 0 : index
    %c0_22 = arith.constant 0 : index
    %38 = vector.load %arg3[%c1_20, %c0_21, %c0_22] : memref<2x32x128xbf16, #tpu.memory_space<vmem>>, vector<1x32x128xbf16>
    %39 = vector.shape_cast %38 : vector<1x32x128xbf16> to vector<32x128xbf16>
    %40 = arith.extf %39 : vector<32x128xbf16> to vector<32x128xf32>
    %cst_23 = arith.constant dense<0.000000e+00> : vector<1x128xf32>
    %41 = tpu.matmul %35, %40, %cst_23 {dimension_numbers = #tpu.dot_dimension_numbers<[1], [0], [0], [1], [0, 0, 1, 1], [], []>} : vector<1x32xf32>, vector<32x128xf32>, vector<1x128xf32> -> vector<1x128xf32>
    %c1_24 = arith.constant 1 : index
    %c0_25 = arith.constant 0 : index
    %c0_26 = arith.constant 0 : index
    %42 = vector.load %arg4[%c1_24, %c0_25, %c0_26] : memref<2x32x128xbf16, #tpu.memory_space<vmem>>, vector<1x32x128xbf16>
    %43 = vector.shape_cast %42 : vector<1x32x128xbf16> to vector<32x128xbf16>
    %44 = arith.extf %43 : vector<32x128xbf16> to vector<32x128xf32>
    %cst_27 = arith.constant dense<0.000000e+00> : vector<1x128xf32>
    %45 = tpu.matmul %37, %44, %cst_27 {dimension_numbers = #tpu.dot_dimension_numbers<[1], [0], [0], [1], [0, 0, 1, 1], [], []>} : vector<1x32xf32>, vector<32x128xf32>, vector<1x128xf32> -> vector<1x128xf32>
    %46 = arith.addf %41, %45 : vector<1x128xf32>
    %c1_28 = arith.constant 1 : index
    %c0_29 = arith.constant 0 : index
    %c0_30 = arith.constant 0 : index
    %47 = vector.load %arg5[%c1_28, %c0_29, %c0_30] : memref<2x1x128xf32, #tpu.memory_space<vmem>>, vector<1x1x128xf32>
    %48 = vector.shape_cast %47 : vector<1x1x128xf32> to vector<1x128xf32>
    %49 = arith.addf %46, %48 : vector<1x128xf32>
    %50 = vector.extract_strided_slice %49 {offsets = [0, 0], sizes = [1, 64], strides = [1, 1]} : vector<1x128xf32> to vector<1x64xf32>
    %51 = arith.negf %50 : vector<1x64xf32>
    %52 = math.exp %51 : vector<1x64xf32>
    %cst_31 = arith.constant 1.000000e+00 : f32
    %53 = vector.broadcast %cst_31 : f32 to vector<1x64xf32>
    %54 = arith.addf %53, %52 : vector<1x64xf32>
    %55 = arith.divf %53, %54 : vector<1x64xf32>
    %56 = vector.extract_strided_slice %55 {offsets = [0, 0], sizes = [1, 32], strides = [1, 1]} : vector<1x64xf32> to vector<1x32xf32>
    %57 = vector.extract_strided_slice %55 {offsets = [0, 32], sizes = [1, 32], strides = [1, 1]} : vector<1x64xf32> to vector<1x32xf32>
    %58 = vector.extract_strided_slice %49 {offsets = [0, 64], sizes = [1, 32], strides = [1, 1]} : vector<1x128xf32> to vector<1x32xf32>
    %59 = vector.extract_strided_slice %49 {offsets = [0, 96], sizes = [1, 32], strides = [1, 1]} : vector<1x128xf32> to vector<1x32xf32>
    %60 = arith.mulf %56, %59 : vector<1x32xf32>
    %61 = arith.addf %58, %60 : vector<1x32xf32>
    %62 = math.tanh %61 : vector<1x32xf32>
    %cst_32 = arith.constant 1.000000e+00 : f32
    %63 = vector.broadcast %cst_32 : f32 to vector<1x32xf32>
    %64 = arith.subf %63, %57 : vector<1x32xf32>
    %65 = arith.mulf %64, %62 : vector<1x32xf32>
    %66 = arith.mulf %57, %37 : vector<1x32xf32>
    %67 = arith.addf %65, %66 : vector<1x32xf32>
    %c1_33 = arith.constant 1 : index
    %c0_34 = arith.constant 0 : index
    %68 = vector.load %arg8[%c1_33, %c0_34] : memref<2x32xf32, #tpu.memory_space<vmem>>, vector<1x32xf32>
    tpu.vector_store %arg8[%c1_33, %c0_34], %67 {strides = array<i32>} : memref<2x32xf32, #tpu.memory_space<vmem>>, vector<1x32xf32>,
    %c0_35 = arith.constant 0 : index
    %c0_36 = arith.constant 0 : index
    %c0_37 = arith.constant 0 : index
    %69 = vector.load %arg6[%c0_35, %c0_36, %c0_37] : memref<1x1x32xf32, #tpu.memory_space<vmem>>, vector<1x1x32xf32>
    %70 = vector.shape_cast %69 : vector<1x1x32xf32> to vector<1x32xf32>
    %71 = vector.shape_cast %67 : vector<1x32xf32> to vector<1x1x32xf32>
    tpu.vector_store %arg6[%c0_35, %c0_36, %c0_37], %71 {strides = array<i32>} : memref<1x1x32xf32, #tpu.memory_space<vmem>>, vector<1x1x32xf32>,
    %c0_i32_38 = arith.constant 0 : i32
    %72 = arith.cmpi eq, %arg0, %c0_i32_38 : i32
    %73 = arith.extui %72 : i1 to i32
    %c0_i32_39 = arith.constant 0 : i32
    %74 = arith.cmpi ne, %73, %c0_i32_39 : i32
    scf.if %74 {
      %c0_40 = arith.constant 0 : index
      %c0_41 = arith.constant 0 : index
      %75 = vector.load %arg8[%c0_40, %c0_41] : memref<2x32xf32, #tpu.memory_space<vmem>>, vector<2x32xf32>
      %c0_42 = arith.constant 0 : index
      %c0_43 = arith.constant 0 : index
      %76 = vector.load %arg7[%c0_42, %c0_43] : memref<2x32xf32, #tpu.memory_space<vmem>>, vector<2x32xf32>
      tpu.vector_store %arg7[%c0_42, %c0_43], %75 {strides = array<i32>} : memref<2x32xf32, #tpu.memory_space<vmem>>, vector<2x32xf32>,
    } else {
    }
    return
  }
  func.func @transform_0(%arg0: i32) -> (i32, i32, i32) {
    %c0_i32 = arith.constant 0 : i32
    %c0_i32_0 = arith.constant 0 : i32
    %c0_i32_1 = arith.constant 0 : i32
    return %arg0, %c0_i32, %c0_i32_0 : i32, i32, i32
  }
  func.func @transform_1(%arg0: i32) -> (i32, i32) {
    %c0_i32 = arith.constant 0 : i32
    %c0_i32_0 = arith.constant 0 : i32
    %c0_i32_1 = arith.constant 0 : i32
    return %c0_i32, %c0_i32_0 : i32, i32
  }
  func.func @transform_2(%arg0: i32) -> (i32, i32, i32) {
    %c0_i32 = arith.constant 0 : i32
    %c0_i32_0 = arith.constant 0 : i32
    %c0_i32_1 = arith.constant 0 : i32
    %c0_i32_2 = arith.constant 0 : i32
    return %c0_i32, %c0_i32_0, %c0_i32_1 : i32, i32, i32
  }
  func.func @transform_3(%arg0: i32) -> (i32, i32, i32) {
    %c0_i32 = arith.constant 0 : i32
    %c0_i32_0 = arith.constant 0 : i32
    %c0_i32_1 = arith.constant 0 : i32
    %c0_i32_2 = arith.constant 0 : i32
    return %c0_i32, %c0_i32_0, %c0_i32_1 : i32, i32, i32
  }
  func.func @transform_4(%arg0: i32) -> (i32, i32, i32) {
    %c0_i32 = arith.constant 0 : i32
    %c0_i32_0 = arith.constant 0 : i32
    %c0_i32_1 = arith.constant 0 : i32
    %c0_i32_2 = arith.constant 0 : i32
    return %c0_i32, %c0_i32_0, %c0_i32_1 : i32, i32, i32
  }
  func.func @transform_5(%arg0: i32) -> (i32, i32, i32) {
    %c0_i32 = arith.constant 0 : i32
    %c0_i32_0 = arith.constant 0 : i32
    %c0_i32_1 = arith.constant 0 : i32
    return %arg0, %c0_i32, %c0_i32_0 : i32, i32, i32
  }
  func.func @transform_6(%arg0: i32) -> (i32, i32) {
    %c0_i32 = arith.constant 0 : i32
    %c0_i32_0 = arith.constant 0 : i32
    %c0_i32_1 = arith.constant 0 : i32
    return %c0_i32, %c0_i32_0 : i32, i32
  }
}

</mosaic_0001>

<bundles_post_ra>
// kernel: sequence_predictor_forward.1
= control target key start
LH: loop header
LB: loop body
LE: loop exit
PB: predicated region body
PF: predicated region fallthrough
CT: control target
= control target key end

     0   :  { %12 = vsyncpa [#allocation4], 0  ;;  %s588_s0 = inlined_call_operand.vmem [shape: f32[1,1,32], index: 0, kind: input, shape index: {}]   ;;  %s589_s1 = inlined_call_operand.vmem [shape: f32[2,32], index: 1, kind: input, shape index: {}]   ;;  %s590_s2 = inlined_call_operand.hbm [shape: bf16[2,32,128], index: 2, kind: input, shape index: {}]   ;;  %s591_s3 = inlined_call_operand.hbm [shape: bf16[2,32,128], index: 3, kind: input, shape index: {}]   ;;  %s592_s4 = inlined_call_operand.vmem [shape: f32[2,1,128], index: 4, kind: input, shape index: {}]   ;;  %s593_s5 = inlined_call_operand.hbm [shape: f32[1,1,32], index: 5, kind: output, shape index: {0}]   ;;  %s594_s6 = inlined_call_operand.hbm [shape: f32[2,32], index: 6, kind: output, shape index: {1}]  }
   0x1   :  { %13 = vsyncpa [#allocation7], 0 }
   0x2   :  { %14 = vsyncpa [#allocation5], 0 }
   0x3   :  { %15 = vsyncpa [#allocation10], 0  ;;  %s24_s23 = sshll.u32 %s590_s2, 4  ;;  %s498_s24 = smov [#allocation3]   ;;  %s25_s23 = int_to_ptr.hbm [resolvable:$true] %s24_s23 }
   0x4   :  { %s26_s25 = sshll.u32 %s498_s24, 4  ;;  %s37_s28 = sshll.u32 %s591_s3, 4  ;;  %s27_s25 = int_to_ptr.vmem [resolvable:$true] %s26_s25  ;;  %s38_s28 = int_to_ptr.hbm [resolvable:$true] %s37_s28 }
   0x5   :  { %s499_s29 = smov 64   ;;  %s500_s30 = smov 4  }
   0x6   :  { %32 = dma.hbm_to_vmem [thread:$0]  %s25_s23, 512, %s27_s25, [#allocation4], %s499_s29, %s499_s29, %s500_s30  }
   0x7   :  { %s501_s7 = smov [#allocation6]  }
   0x8   :  { %s39_s8 = sshll.u32 %s501_s7, 4  ;;  %s40_s8 = int_to_ptr.vmem [resolvable:$true] %s39_s8 }
   0x9   :  { %45 = dma.hbm_to_vmem [thread:$0]  %s38_s28, 512, %s40_s8, [#allocation7], %s499_s29, %s499_s29, %s500_s30  }
   0xa   :  { %490 = dma.done.wait [#allocation4], 512  }
   0xb   :  { %491 = vsyncadd [#allocation4], 4294966784 }
   0xc   :  { %492 = dma.done.wait [#allocation7], 512  }
   0xd   :  { %493 = vsyncadd [#allocation7], 4294966784  ;;  %vm61_vm0 = vcmask 254976   ;;  %v371_v0 = vld [vmem:[#allocation6 + $0x8] sm:$0xff]   ;;  %v347_v2 = vld [vmem:[#allocation6] sm:$0xff]   ;;  %vm81_vm1 = vcmask 261120  }
   0xe   :  { %v370_v1 = vld [vmem:[#allocation3 + $0x8] sm:$0xff]   ;;  %v353_v3 = vunpack.c.h.bf16 %v371_v0  ;;  %v352_v5 = vunpack.c.l.bf16 %v371_v0  ;;  %v339_v7 = vld [vmem:[#allocation3] sm:$0xff]   ;;  %v60_v8 = vld [vmem:[%s589_s1] sm:$0x3]  ;;  %v349_v9 = vunpack.c.h.bf16 %v347_v2  ;;  %v348_v11 = vunpack.c.l.bf16 %v347_v2  ;;  %s502_s12 = smov 32   ;;  %s304_s18 = sshll.u32 %s593_s5, 4  ;;  %s305_s18 = int_to_ptr.hbm [resolvable:$true] %s304_s18 }
   0xf   :  { %v345_v4 = vunpack.c.h.bf16 %v370_v1  ;;  %v344_v6 = vunpack.c.l.bf16 %v370_v1  ;;  %62 = vst.msk [vmem:[#allocation2] sm:$0x3] %vm61_vm0, %v60_v8  ;;  %v341_v10 = vunpack.c.h.bf16 %v339_v7  ;;  %v340_v12 = vunpack.c.l.bf16 %v339_v7  ;;  %v63_v13 = vld [vmem:[%s588_s0] sm:$0x1]  ;;  %s503_s0 = smov 96   ;;  %v363_v40 = vld [vmem:[#allocation6 + $0x10] sm:$0xff]  }
  0x10   :  { %97 = vmatpush.msra.mxu0 %v353_v3  ;;  %v128_v17 = vld [vmem:[%s592_s4] sm:$0x1]  ;;  %v355_v45 = vld [vmem:[#allocation3 + $0x10] sm:$0xff]   ;;  %v365_v46 = vunpack.c.h.bf16 %v363_v40  ;;  %v364_v48 = vunpack.c.l.bf16 %v363_v40  ;;  %vm175_vm6 = vcmask 253952   ;;  %v336_v60 = vld [vmem:[%s592_s4 + $0x1] sm:$0x1] }
  0x11   :  { %120 = vmatpush.msra.mxu1 %v345_v4  ;;  %v373_v38 = vld [vmem:[#allocation6 + $0x18] sm:$0xff]   ;;  %v357_v47 = vunpack.c.h.bf16 %v355_v45  ;;  %v356_v49 = vunpack.c.l.bf16 %v355_v45  ;;  %s504_s4 = smov [#allocation8]   ;;  %s505_s19 = smov [#allocation9]  }
  0x12   :  { %98 = vmatpush.msra.mxu0 %v352_v5  ;;  %v372_v39 = vld [vmem:[#allocation3 + $0x18] sm:$0xff]   ;;  %v369_v41 = vunpack.c.h.bf16 %v373_v38  ;;  %v368_v43 = vunpack.c.l.bf16 %v373_v38  ;;  %s302_s15 = sshll.u32 %s504_s4, 4  ;;  %s313_s20 = sshll.u32 %s505_s19, 4  ;;  %s303_s15 = int_to_ptr.vmem [resolvable:$true] %s302_s15  ;;  %s314_s20 = int_to_ptr.vmem [resolvable:$true] %s313_s20 }
  0x13   :  { %121 = vmatpush.msra.mxu1 %v344_v6  ;;  %v361_v42 = vunpack.c.h.bf16 %v372_v39  ;;  %v360_v44 = vunpack.c.l.bf16 %v372_v39  ;;  %s315_s23 = sshll.u32 %s594_s6, 4  ;;  %s316_s23 = int_to_ptr.hbm [resolvable:$true] %s315_s23 }
  0x14   :  { %99 = vmatpush.msra.mxu0 %v349_v9  ;;  %211 = vmatpush.msra.mxu2 %v369_v41 }
  0x15   :  { %122 = vmatpush.msra.mxu1 %v341_v10  ;;  %233 = vmatpush.msra.mxu3 %v361_v42 }
  0x16   :  { %100 = vmatpush.msra.mxu0 %v348_v11  ;;  %v64_v14 = vld [vmem:[#allocation2] sm:$0x1]  ;;  %212 = vmatpush.msra.mxu2 %v368_v43  ;;  %v177_v56 = vld [vmem:[#allocation2 + $0x1] sm:$0x1] }
  0x17   :  { %123 = vmatpush.msra.mxu1 %v340_v12  ;;  %331 = vmatmul.msk.f32.vlgmr.msra.gmra.mxu0 %vm81_vm1, %v64_v14 }
  0x18   :  { %332 = vmatmul.msk.f32.vlgmr.msra.gmra.mxu1 %vm81_vm1, %v63_v13  ;;  %234 = vmatpush.msra.mxu3 %v360_v44 }
  0x19   :  { %213 = vmatpush.msra.mxu2 %v365_v46 }
  0x1a   :  { %235 = vmatpush.msra.mxu3 %v357_v47 }
  0x1b   :  { %214 = vmatpush.msra.mxu2 %v364_v48 }
  0x1c   :  { %236 = vmatpush.msra.mxu3 %v356_v49  ;;  %334 = vmatmul.msk.f32.vlgmr.msra.gmra.mxu2 %vm81_vm1, %v177_v56 }
  0x94   :  { %v102_v15 = vpop.f32.mrf.mxu0 }
  0x95   :  { %v125_v16 = vpop.f32.mrf.mxu1 }
  0x96   :  { %v126_v18 = vadd.f32 %v125_v16, %v102_v15 }
  0x98   :  { %v129_v19 = vadd.f32 %v128_v17, %v126_v18 }
  0x9a   :  { %150 = vrot.lane.b32.xlu0 %v129_v19, %s502_s12  ;;  %v333_v20 = vmul.f32 -1.442695, %v129_v19 }
  0x9c   :  { %382 = vpow2.f32 %v333_v20 }
  0x9f   :  { %v216_v58 = vpop.f32.mrf.mxu2 }
  0xa2   :  { %v383_v21 = vpop.eup %382 }
  0xa3   :  { %v133_v22 = vadd.f32 1.0, %v383_v21 }
  0xa5   :  { %384 = vrcp.f32 %v133_v22  ;;  %v145_v28 = vand.u32 2147483648, %v133_v22  ;;  %vm139_vm3 = vweird.f32 %v133_v22  ;;  %v143_v29 = vand.u32 2147483647, %v133_v22 }
  0xa7   :  { %v146_v31 = vor.u32 1.1754944e-38, %v145_v28  ;;  %vm144_vm5 = vcmp.eq.f32.partialorder %v143_v29, 8.507059e+37 }
  0xab   :  { %v385_v23 = vpop.eup %384 }
  0xac   :  { %v135_v24 = vmul.f32 %v385_v23, %v133_v22  ;;  %vm140_vm2 = vweird.f32 %v385_v23 }
  0xad   :  { %vm141_vm4 = vmor %vm139_vm3, %vm140_vm2 }
  0xae   :  { %v136_v25 = vsub.f32 1.0, %v135_v24 }
  0xb0   :  { %v137_v26 = vmul.f32 %v385_v23, %v136_v25 }
  0xb2   :  { %v138_v27 = vadd.f32 %v385_v23, %v137_v26 }
  0xb4   :  { %v142_v30 = vsel %vm141_vm4, %v385_v23, %v138_v27 }
  0xb5   :  { %v147_v33 = vsel %vm144_vm5, %v146_v31, %v142_v30 }
  0xb6   :  { %v160_v51 = vsub.f32 1.0, %v147_v33 }
 0x10c   :  { %v151_v32 = vpop.permute.xlu0 %150 }
 0x10d   :  { %v153_v34 = vmul.f32 %v151_v32, %v147_v33 }
 0x10f   :  { %155 = vrot.lane.b32.xlu0 %v153_v34, %s499_s29 }
 0x181   :  { %v156_v35 = vpop.permute.xlu0 %155 }
 0x182   :  { %v158_v36 = vadd.f32 %v156_v35, %v129_v19 }
 0x184   :  { %386 = vtanh.f32 %v158_v36 }
 0x18a   :  { %v387_v37 = vpop.eup %386 }
 0x18b   :  { %162 = vrot.lane.b32.xlu1 %v387_v37, %s503_s0 }
 0x193   :  { %166 = vrot.lane.b32.xlu1 %v64_v14, %s502_s12 }
 0x1fd   :  { %v163_v50 = vpop.permute.xlu1 %162 }
 0x1fe   :  { %v165_v53 = vmul.f32 %v163_v50, %v160_v51 }
 0x205   :  { %v167_v52 = vpop.permute.xlu1 %166 }
 0x206   :  { %v169_v54 = vmul.f32 %v167_v52, %v147_v33 }
 0x208   :  { %v170_v55 = vadd.f32 %v169_v54, %v165_v53 }
 0x20a   :  { %172 = vrot.lane.b32.xlu2 %v170_v55, %s503_s0 }
 0x264   :  { %v173_v57 = vpop.permute.xlu2 %172 }
 0x265   :  { %335 = vmatmul.msk.f32.vlgmr.msra.gmra.mxu3 %vm81_vm1, %v173_v57  ;;  %176 = vst.msk [vmem:[#allocation2] sm:$0x1] %vm175_vm6, %v173_v57 }
 0x2e8   :  { %v238_v59 = vpop.f32.mrf.mxu3 }
 0x2e9   :  { %v239_v61 = vadd.f32 %v238_v59, %v216_v58 }
 0x2eb   :  { %v243_v62 = vadd.f32 %v336_v60, %v239_v61 }
 0x2ed   :  { %264 = vrot.lane.b32.xlu2 %v243_v62, %s502_s12  ;;  %v337_v63 = vmul.f32 -1.442695, %v243_v62 }
 0x2ef   :  { %388 = vpow2.f32 %v337_v63 }
 0x2f5   :  { %280 = vrot.lane.b32.xlu2 %v177_v56, %s502_s12  ;;  %v389_v0 = vpop.eup %388 }
 0x2f6   :  { %v247_v1 = vadd.f32 1.0, %v389_v0 }
 0x2f8   :  { %390 = vrcp.f32 %v247_v1  ;;  %v259_v7 = vand.u32 2147483648, %v247_v1  ;;  %vm253_vm8 = vweird.f32 %v247_v1  ;;  %v257_v8 = vand.u32 2147483647, %v247_v1 }
 0x2fa   :  { %v260_v10 = vor.u32 1.1754944e-38, %v259_v7  ;;  %vm258_vm10 = vcmp.eq.f32.partialorder %v257_v8, 8.507059e+37 }
 0x2fe   :  { %v391_v2 = vpop.eup %390 }
 0x2ff   :  { %v249_v3 = vmul.f32 %v391_v2, %v247_v1  ;;  %vm254_vm7 = vweird.f32 %v391_v2 }
 0x300   :  { %vm255_vm9 = vmor %vm253_vm8, %vm254_vm7 }
 0x301   :  { %v250_v4 = vsub.f32 1.0, %v249_v3 }
 0x303   :  { %v251_v5 = vmul.f32 %v391_v2, %v250_v4 }
 0x305   :  { %v252_v6 = vadd.f32 %v391_v2, %v251_v5 }
 0x307   :  { %v256_v9 = vsel %vm255_vm9, %v391_v2, %v252_v6 }
 0x308   :  { %v261_v12 = vsel %vm258_vm10, %v260_v10, %v256_v9 }
 0x309   :  { %v274_v18 = vsub.f32 1.0, %v261_v12 }
 0x347   :  { %v265_v11 = vpop.permute.xlu2 %264 }
 0x348   :  { %v267_v13 = vmul.f32 %v265_v11, %v261_v12 }
 0x34a   :  { %269 = vrot.lane.b32.xlu0 %v267_v13, %s499_s29 }
 0x34f   :  { %v281_v17 = vpop.permute.xlu2 %280 }
 0x350   :  { %v283_v20 = vmul.f32 %v281_v17, %v261_v12 }
 0x3bc   :  { %v270_v14 = vpop.permute.xlu0 %269 }
 0x3bd   :  { %v272_v15 = vadd.f32 %v270_v14, %v243_v62 }
 0x3bf   :  { %392 = vtanh.f32 %v272_v15 }
 0x3c5   :  { %v393_v16 = vpop.eup %392 }
 0x3c6   :  { %276 = vrot.lane.b32.xlu1 %v393_v16, %s503_s0 }
 0x438   :  { %v277_v19 = vpop.permute.xlu1 %276 }
 0x439   :  { %v279_v21 = vmul.f32 %v277_v19, %v274_v18 }
 0x43b   :  { %v284_v22 = vadd.f32 %v283_v20, %v279_v21 }
 0x43d   :  { %286 = vrot.lane.b32.xlu0 %v284_v22, %s503_s0 }
 0x4af   :  { %v287_v23 = vpop.permute.xlu0 %286 }
 0x4b0   :  { %289 = vst.msk [vmem:[#allocation2 + $0x1] sm:$0x1] %vm175_vm6, %v287_v23 }
 0x4b1   :  { %290 = vst.msk [vmem:[#allocation8] sm:$0x1] %vm175_vm6, %v287_v23 }
 0x4b2   :  { %307 = dma.vmem_to_hbm [thread:$0]  %s303_s15, 16, %s305_s18, [#allocation5]  }
 0x4b7   :  { %v294_v24 = vld [vmem:[#allocation2] sm:$0x3] }
 0x4b8   :  { %296 = vst.msk [vmem:[#allocation9] sm:$0x3] %vm61_vm0, %v294_v24 }
 0x4b9   :  { %318 = dma.vmem_to_hbm [thread:$0]  %s314_s20, 32, %s316_s23, [#allocation10]  }
 0x4ba   :  { %494 = dma.done.wait [#allocation5], 16  }
 0x4bb   :  { %495 = vsyncadd [#allocation5], 4294967280 }
 0x4bc   :  { %496 = dma.done.wait [#allocation10], 32  }
 0x4bd   :  { %497 = vsyncadd [#allocation10], 4294967264 }
 0x4be   :  { %327 = vsyncpa [#allocation4], 1 }
 0x4bf   :  { %328 = vsyncpa [#allocation7], 1 }
 0x4c0   :  { %329 = vsyncpa [#allocation5], 1 }
 0x4c1   :  { %330 = vsyncpa [#allocation10], 1 }

</bundles_post_ra>
